<compile_context>
chip_gen: v6e
topology: v6e:2x2x1
jax: 0.10.0
libtpu: 0.0.40
codegen_flags: <defaults>
</compile_context>

<pallas_src>
import functools

import jax
import jax.numpy as jnp
from jax.experimental import pallas as pl
from jax.experimental.pallas import tpu as pltpu


def _motion_masked_mse_kernel(ref_ref, gen_ref, out_ref, *, C, HWp, T, inv_den):
    """One grid step = Bblk whole sequences packed into a (TM, C*HWp) block.

    Row r of the block is frame (r % T) of sequence (r // T); rows with r % T == 0
    (first frame of each sequence, including the wrap-around of the roll) are zeroed.
    """
    TM = ref_ref.shape[0]

    sq = None     # sum_c (ref_c - gen_c)^2               -> (TM, HWp)
    msum = None   # sum_c |ref_c[r] - ref_c[r-1]|         -> (TM, HWp)
    for c in range(C):
        lo = c * HWp
        hi = lo + HWp
        rc = ref_ref[:, lo:hi].astype(jnp.float32)        # cast in VMEM (free; VPU slack)
        gc = gen_ref[:, lo:hi].astype(jnp.float32)
        dc = rc - gc
        sq = dc * dc if sq is None else sq + dc * dc
        # Predecessor frame via sublane rotation (XLU slot; no unaligned slices).
        pc = pltpu.roll(rc, shift=1, axis=0)
        ac = jnp.abs(rc - pc)
        msum = ac if msum is None else msum + ac

    # mask factors out of the channel sum:
    #   out[r] = sum_hw( sq[r] * msum[r] ) / (C * C * HW)       (padded lanes contribute 0)
    col = jnp.sum(sq * msum, axis=1, keepdims=True)             # (TM, 1)
    row = jax.lax.broadcasted_iota(jnp.int32, (TM, 1), 0)
    out_ref[...] = jnp.where(row % T == 0, jnp.float32(0.0), col * inv_den)


def _pick_sequences_per_block(B, T, row_bytes, sublane, max_block_bytes):
    """Largest divisor Bblk of B such that TM = Bblk*T is sublane-aligned (or Bblk == B,
    in which case TM equals the full array dim) and the per-input block fits the byte
    budget.  Falls back to the smallest legal divisor if nothing fits."""
    chosen = None
    for bb in range(1, B + 1):
        if B % bb:
            continue
        tm = bb * T
        if (tm % sublane != 0) and (bb != B):
            continue
        if tm * row_bytes <= max_block_bytes:
            chosen = bb                    # keep the largest block within budget
        else:
            if chosen is None:
                chosen = bb                # nothing fits: take the smallest legal block
            break
    return chosen if chosen is not None else B


@jax.jit
def motion_masked_mse(reference_observations, generated_observations):
    """reference/generated: (bs, T, C, H, W)  ->  (bs, T) motion-masked MSE."""
    B, T, C, H, W = reference_observations.shape
    assert C == 3, "MotionMaskCalculator requires 3 channels"
    HW = H * W
    HWp = ((HW + 127) // 128) * 128        # per-channel lane width, multiple of 128

    def flatten(x):
        x = x.reshape(B * T, C, HW)        # contiguous (free) reshape
        if HWp != HW:
            x = jnp.pad(x, ((0, 0), (0, 0), (0, HWp - HW)))   # keep channel slices tile-aligned
        return x.reshape(B * T, C * HWp)

    ref2 = flatten(reference_observations)     # native dtype; cast happens in-kernel
    gen2 = flatten(generated_observations)

    itemsize = ref2.dtype.itemsize
    sublane = {4: 8, 2: 16, 1: 32}.get(itemsize, 8)
    row_bytes = C * HWp * itemsize

    MAX_BLOCK_BYTES = 2 * 1024 * 1024      # per-input block; 2 in x 2 bufs ~ 8 MiB pipelined
    Bblk = _pick_sequences_per_block(B, T, row_bytes, sublane, MAX_BLOCK_BYTES)
    TM = Bblk * T
    grid = (B // Bblk,)

    # Explicit scoped-VMEM budget: pipelined input buffers + f32 working set + headroom.
    block_in_bytes = TM * row_bytes
    work_f32_bytes = TM * HWp * 4
    vmem_limit = int(max(32 * 1024 * 1024,
                         4 * block_in_bytes + 12 * work_f32_bytes + (4 << 20)))

    kernel = functools.partial(
        _motion_masked_mse_kernel, C=C, HWp=HWp, T=T, inv_den=1.0 / (C * C * HW))

    out = pl.pallas_call(
        kernel,
        out_shape=jax.ShapeDtypeStruct((B * T, 1), jnp.float32),
        grid_spec=pltpu.PrefetchScalarGridSpec(
            num_scalar_prefetch=0,
            grid=grid,
            in_specs=[
                pl.BlockSpec((TM, C * HWp), lambda i: (i, 0)),
                pl.BlockSpec((TM, C * HWp), lambda i: (i, 0)),
            ],
            out_specs=pl.BlockSpec((TM, 1), lambda i: (i, 0)),
        ),
        compiler_params=pltpu.CompilerParams(
            dimension_semantics=("parallel",),
            vmem_limit_bytes=vmem_limit,
        ),
    )(ref2, gen2)
    return out.reshape(B, T)


if __name__ == "__main__":
    key = jax.random.PRNGKey(0)
    k_ref, k_gen = jax.random.split(key)

    bs, T, C, H, W = 2, 8, 3, 16, 16
    reference = jax.random.normal(k_ref, (bs, T, C, H, W), jnp.float32)
    generated = jax.random.normal(k_gen, (bs, T, C, H, W), jnp.float32)

    out = motion_masked_mse(reference, generated)
    jax.block_until_ready(out)

    # Pure-JAX reference (mirrors the PyTorch module exactly).
    succ = reference[:, 1:]
    pred = reference[:, :-1]
    mm = jnp.abs(succ - pred).sum(axis=2, keepdims=True) / 3.0
    mm = jnp.concatenate([jnp.zeros_like(mm[:, 0:1]), mm], axis=1)
    expected = jnp.mean((reference - generated) ** 2 * mm, axis=(2, 3, 4))

    assert out.shape == (bs, T), out.shape
    assert bool(jnp.all(jnp.isfinite(out)))
    assert bool(jnp.allclose(out, expected, rtol=1e-4, atol=1e-5)), (out, expected)
    print("KERNEL_OK")
</pallas_src>

<mosaic_0001>
module attributes {stable_mosaic.version = 11 : i64} {
  func.func @_motion_masked_mse_kernel(%arg0: i32, %arg1: memref<16x768xf32, #tpu.memory_space<vmem>>, %arg2: memref<16x768xf32, #tpu.memory_space<vmem>>, %arg3: memref<16x1xf32, #tpu.memory_space<vmem>>) attributes {dimension_semantics = [#tpu.dimension_semantics<parallel>], iteration_bounds = array<i64: 1>, scalar_prefetch = 0 : i64, scratch_operands = 0 : i64, tpu.core_type = #tpu.core_type<tc>, window_params = [{transform_indices = @transform_0, window_bounds = array<i64: 16, 768>}, {transform_indices = @transform_1, window_bounds = array<i64: 16, 768>}, {transform_indices = @transform_2, window_bounds = array<i64: 16, 1>}]} {
    %c0 = arith.constant 0 : index
    %c0_0 = arith.constant 0 : index
    %0 = vector.load %arg1[%c0, %c0_0] : memref<16x768xf32, #tpu.memory_space<vmem>>, vector<16x256xf32>
    %c0_1 = arith.constant 0 : index
    %c0_2 = arith.constant 0 : index
    %1 = vector.load %arg2[%c0_1, %c0_2] : memref<16x768xf32, #tpu.memory_space<vmem>>, vector<16x256xf32>
    %2 = arith.subf %0, %1 : vector<16x256xf32>
    %3 = arith.mulf %2, %2 : vector<16x256xf32>
    %c1_i32 = arith.constant 1 : i32
    %4 = tpu.dynamic_rotate %0 by %c1_i32 dim 0 : vector<16x256xf32>, i32 -> vector<16x256xf32>
    %5 = arith.subf %0, %4 : vector<16x256xf32>
    %6 = math.absf %5 : vector<16x256xf32>
    %c0_3 = arith.constant 0 : index
    %c256 = arith.constant 256 : index
    %7 = vector.load %arg1[%c0_3, %c256] : memref<16x768xf32, #tpu.memory_space<vmem>>, vector<16x256xf32>
    %c0_4 = arith.constant 0 : index
    %c256_5 = arith.constant 256 : index
    %8 = vector.load %arg2[%c0_4, %c256_5] : memref<16x768xf32, #tpu.memory_space<vmem>>, vector<16x256xf32>
    %9 = arith.subf %7, %8 : vector<16x256xf32>
    %10 = arith.mulf %9, %9 : vector<16x256xf32>
    %11 = arith.addf %3, %10 : vector<16x256xf32>
    %c1_i32_6 = arith.constant 1 : i32
    %12 = tpu.dynamic_rotate %7 by %c1_i32_6 dim 0 : vector<16x256xf32>, i32 -> vector<16x256xf32>
    %13 = arith.subf %7, %12 : vector<16x256xf32>
    %14 = math.absf %13 : vector<16x256xf32>
    %15 = arith.addf %6, %14 : vector<16x256xf32>
    %c0_7 = arith.constant 0 : index
    %c512 = arith.constant 512 : index
    %16 = vector.load %arg1[%c0_7, %c512] : memref<16x768xf32, #tpu.memory_space<vmem>>, vector<16x256xf32>
    %c0_8 = arith.constant 0 : index
    %c512_9 = arith.constant 512 : index
    %17 = vector.load %arg2[%c0_8, %c512_9] : memref<16x768xf32, #tpu.memory_space<vmem>>, vector<16x256xf32>
    %18 = arith.subf %16, %17 : vector<16x256xf32>
    %19 = arith.mulf %18, %18 : vector<16x256xf32>
    %20 = arith.addf %11, %19 : vector<16x256xf32>
    %c1_i32_10 = arith.constant 1 : i32
    %21 = tpu.dynamic_rotate %16 by %c1_i32_10 dim 0 : vector<16x256xf32>, i32 -> vector<16x256xf32>
    %22 = arith.subf %16, %21 : vector<16x256xf32>
    %23 = math.absf %22 : vector<16x256xf32>
    %24 = arith.addf %15, %23 : vector<16x256xf32>
    %25 = arith.mulf %20, %24 : vector<16x256xf32>
    %cst = arith.constant dense<0.000000e+00> : vector<16xf32>
    %26 = vector.multi_reduction <add>, %25, %cst [1] : vector<16x256xf32> to vector<16xf32>
    %27 = vector.shape_cast %26 : vector<16xf32> to vector<16x1xf32>
    %28 = tpu.iota {dimensions = array<i32: 0>} : vector<16x1xi32>
    %c8_i32 = arith.constant 8 : i32
    %c0_i32 = arith.constant 0 : i32
    %29 = arith.cmpi eq, %c8_i32, %c0_i32 : i32
    %c1_i32_11 = arith.constant 1 : i32
    %30 = arith.select %29, %c1_i32_11, %c8_i32 : i32
    %31 = vector.broadcast %30 : i32 to vector<16x1xi32>
    %32 = arith.remsi %28, %31 : vector<16x1xi32>
    %c0_i32_12 = arith.constant 0 : i32
    %33 = vector.broadcast %c0_i32_12 : i32 to vector<16x1xi32>
    %34 = arith.cmpi ne, %32, %33 : vector<16x1xi32>
    %c0_i32_13 = arith.constant 0 : i32
    %35 = vector.broadcast %c0_i32_13 : i32 to vector<16x1xi32>
    %36 = arith.cmpi slt, %32, %35 : vector<16x1xi32>
    %c0_i32_14 = arith.constant 0 : i32
    %37 = arith.cmpi slt, %30, %c0_i32_14 : i32
    %38 = vector.broadcast %37 : i1 to vector<16x1xi1>
    %39 = vector.broadcast %38 : vector<16x1xi1> to vector<16x1xi1>
    %40 = arith.xori %36, %39 : vector<16x1xi1>
    %41 = arith.andi %40, %34 : vector<16x1xi1>
    %42 = vector.broadcast %30 : i32 to vector<16x1xi32>
    %43 = arith.addi %32, %42 : vector<16x1xi32>
    %44 = arith.select %41, %43, %32 : vector<16x1xi1>, vector<16x1xi32>
    %c0_i32_15 = arith.constant 0 : i32
    %45 = vector.broadcast %c0_i32_15 : i32 to vector<16x1xi32>
    %46 = arith.cmpi eq, %44, %45 : vector<16x1xi32>
    %cst_16 = arith.constant 4.34027781E-4 : f32
    %47 = vector.broadcast %cst_16 : f32 to vector<16x1xf32>
    %48 = arith.mulf %27, %47 : vector<16x1xf32>
    %cst_17 = arith.constant 0.000000e+00 : f32
    %49 = vector.broadcast %cst_17 : f32 to vector<16x1xf32>
    %50 = arith.select %46, %49, %48 : vector<16x1xi1>, vector<16x1xf32>
    %c0_18 = arith.constant 0 : index
    %c0_19 = arith.constant 0 : index
    %51 = vector.load %arg3[%c0_18, %c0_19] : memref<16x1xf32, #tpu.memory_space<vmem>>, vector<16x1xf32>
    tpu.vector_store %arg3[%c0_18, %c0_19], %50 {strides = array<i32>} : memref<16x1xf32, #tpu.memory_space<vmem>>, vector<16x1xf32>,
    return
  }
  func.func @transform_0(%arg0: i32) -> (i32, i32) {
    %c0_i32 = arith.constant 0 : i32
    %c0_i32_0 = arith.constant 0 : i32
    return %arg0, %c0_i32 : i32, i32
  }
  func.func @transform_1(%arg0: i32) -> (i32, i32) {
    %c0_i32 = arith.constant 0 : i32
    %c0_i32_0 = arith.constant 0 : i32
    return %arg0, %c0_i32 : i32, i32
  }
  func.func @transform_2(%arg0: i32) -> (i32, i32) {
    %c0_i32 = arith.constant 0 : i32
    %c0_i32_0 = arith.constant 0 : i32
    return %arg0, %c0_i32 : i32, i32
  }
}

</mosaic_0001>

<bundles_post_ra>
// kernel: motion_masked_mse.1
= control target key start
LH: loop header
LB: loop body
LE: loop exit
PB: predicated region body
PF: predicated region fallthrough
CT: control target
= control target key end

     0   :  { %v31_v0 = vlaneseq  ;;  %vm167_vm2 = vcmask 7168   ;;  %s380_s0 = inlined_call_operand.vmem [shape: f32[16,768], index: 0, kind: input, shape index: {}]   ;;  %s381_s1 = inlined_call_operand.vmem [shape: f32[16,768], index: 1, kind: input, shape index: {}]   ;;  %s382_s2 = inlined_call_operand.vmem [shape: f32[16,1], index: 2, kind: output, shape index: {}]  }
   0x1   :  { %v192_v1 = vld [vmem:[%s380_s0] sm:$0xff]  ;;  %v197_v2 = vld [vmem:[%s380_s0 + $0x8] sm:$0xff]  ;;  %v202_v3 = vld [vmem:[%s380_s0 + $0x30] sm:$0xff] }
   0x2   :  { %v207_v4 = vld [vmem:[%s380_s0 + $0x38] sm:$0xff]  ;;  %v15_v5 = vld [vmem:[%s381_s1] sm:$0xff]  ;;  %v16_v6 = vld [vmem:[%s381_s1 + $0x8] sm:$0xff]  ;;  %v27_v7 = vrot.slane %v192_v1, 7  ;;  %v28_v8 = vrot.slane %v197_v2, 7  ;;  %v29_v9 = vrot.slane %v202_v3, 7 }
   0x3   :  { %v19_v10 = vsub.f32 %v192_v1, %v15_v5  ;;  %v20_v11 = vsub.f32 %v197_v2, %v16_v6  ;;  %v30_v12 = vrot.slane %v207_v4, 7  ;;  %v221_v13 = vshrl.u32 %v31_v0, 7  ;;  %v226_v14 = vld [vmem:[%s380_s0 + $0x10] sm:$0xff]  ;;  %v231_v15 = vld [vmem:[%s380_s0 + $0x18] sm:$0xff]  ;;  %v236_v16 = vld [vmem:[%s380_s0 + $0x40] sm:$0xff] }
   0x4   :  { %v241_v17 = vld [vmem:[%s380_s0 + $0x48] sm:$0xff]  ;;  %v50_v18 = vld [vmem:[%s381_s1 + $0x10] sm:$0xff]  ;;  %v51_v19 = vld [vmem:[%s381_s1 + $0x18] sm:$0xff]  ;;  %v66_v20 = vrot.slane %v226_v14, 7  ;;  %v67_v21 = vrot.slane %v231_v15, 7  ;;  %v68_v22 = vrot.slane %v236_v16, 7 }
   0x5   :  { %v23_v23 = vmul.f32 %v19_v10, %v19_v10  ;;  %v24_v24 = vmul.f32 %v20_v11, %v20_v11  ;;  %vm33_vm0 = vcmp.lt.s32.totalorder %v221_v13, 1  ;;  %v54_v25 = vsub.f32 %v226_v14, %v50_v18  ;;  %v90_v30 = vld [vmem:[%s381_s1 + $0x20] sm:$0xff]  ;;  %v91_v36 = vld [vmem:[%s381_s1 + $0x28] sm:$0xff]  ;;  %v298_v41 = vld [vmem:[%s380_s0 + $0x50] sm:$0xff] }
   0x6   :  { %v36_v26 = vsel %vm33_vm0, %v29_v9, %v27_v7  ;;  %v37_v27 = vsel %vm33_vm0, %v30_v12, %v28_v8  ;;  %v55_v28 = vsub.f32 %v231_v15, %v51_v19  ;;  %v69_v29 = vrot.slane %v241_v17, 7  ;;  %v280_v35 = vld [vmem:[%s380_s0 + $0x20] sm:$0xff]  ;;  %v293_v40 = vld [vmem:[%s380_s0 + $0x28] sm:$0xff]  ;;  %v305_v47 = vld [vmem:[%s380_s0 + $0x58] sm:$0xff] }
   0x7   :  { %v38_v31 = vsub.f32 %v192_v1, %v36_v26  ;;  %v39_v32 = vsub.f32 %v197_v2, %v37_v27  ;;  %v58_v33 = vmul.f32 %v54_v25, %v54_v25  ;;  %v72_v34 = vsel %vm33_vm0, %v68_v22, %v66_v20  ;;  %v17_v52 = vld [vmem:[%s381_s1 + $0x30] sm:$0xff]  ;;  %v18_v53 = vld [vmem:[%s381_s1 + $0x38] sm:$0xff]  ;;  %v52_v6 = vld [vmem:[%s381_s1 + $0x40] sm:$0xff] }
   0x8   :  { %v59_v37 = vmul.f32 %v55_v28, %v55_v28  ;;  %v73_v38 = vsel %vm33_vm0, %v69_v29, %v67_v21  ;;  %v74_v39 = vsub.f32 %v226_v14, %v72_v34  ;;  %v94_v42 = vsub.f32 %v280_v35, %v90_v30 }
   0x9   :  { %v42_v43 = vand.u32 2147483647, %v38_v31  ;;  %v43_v44 = vand.u32 2147483647, %v39_v32  ;;  %v62_v45 = vadd.f32 %v58_v33, %v23_v23  ;;  %v75_v46 = vsub.f32 %v231_v15, %v73_v38  ;;  %v53_v23 = vld [vmem:[%s381_s1 + $0x48] sm:$0xff] }
   0xa   :  { %v63_v48 = vadd.f32 %v59_v37, %v24_v24  ;;  %v78_v49 = vand.u32 2147483647, %v74_v39  ;;  %v95_v50 = vsub.f32 %v293_v40, %v91_v36  ;;  %v98_v51 = vmul.f32 %v94_v42, %v94_v42 }
   0xb   :  { %v79_v54 = vand.u32 2147483647, %v75_v46  ;;  %v106_v55 = vrot.slane %v280_v35, 7  ;;  %v107_v56 = vrot.slane %v293_v40, 7  ;;  %v108_v57 = vrot.slane %v298_v41, 7 }
   0xc   :  { %v82_v58 = vadd.f32 %v78_v49, %v42_v43  ;;  %v99_v59 = vmul.f32 %v95_v50, %v95_v50  ;;  %v102_v60 = vadd.f32 %v98_v51, %v62_v45  ;;  %v109_v61 = vrot.slane %v305_v47, 7 }
   0xd   :  { %v83_v62 = vadd.f32 %v79_v54, %v43_v44  ;;  %v112_v63 = vsel %vm33_vm0, %v108_v57, %v106_v55  ;;  %v21_v0 = vsub.f32 %v202_v3, %v17_v52  ;;  %v22_v5 = vsub.f32 %v207_v4, %v18_v53 }
   0xe   :  { %v103_v10 = vadd.f32 %v99_v59, %v63_v48  ;;  %v113_v11 = vsel %vm33_vm0, %v109_v61, %v107_v56  ;;  %v114_v18 = vsub.f32 %v280_v35, %v112_v63  ;;  %v34_v19 = vsel %vm33_vm0, %v27_v7, %v29_v9 }
   0xf   :  { %v115_v24 = vsub.f32 %v293_v40, %v113_v11  ;;  %v25_v25 = vmul.f32 %v21_v0, %v21_v0  ;;  %v26_v26 = vmul.f32 %v22_v5, %v22_v5  ;;  %v35_v27 = vsel %vm33_vm0, %v28_v8, %v30_v12 }
  0x10   :  { %v118_v28 = vand.u32 2147483647, %v114_v18  ;;  %v40_v1 = vsub.f32 %v202_v3, %v34_v19  ;;  %v41_v7 = vsub.f32 %v207_v4, %v35_v27  ;;  %v56_v9 = vsub.f32 %v236_v16, %v52_v6  ;;  %v92_v3 = vld [vmem:[%s381_s1 + $0x50] sm:$0xff]  ;;  %v93_v4 = vld [vmem:[%s381_s1 + $0x58] sm:$0xff] }
  0x11   :  { %v119_v30 = vand.u32 2147483647, %v115_v24  ;;  %v57_v31 = vsub.f32 %v241_v17, %v53_v23  ;;  %v70_v32 = vsel %vm33_vm0, %v66_v20, %v68_v22  ;;  %v71_v2 = vsel %vm33_vm0, %v67_v21, %v69_v29 }
  0x12   :  { %v122_v8 = vadd.f32 %v118_v28, %v82_v58  ;;  %v44_v12 = vand.u32 2147483647, %v40_v1  ;;  %v45_v33 = vand.u32 2147483647, %v41_v7  ;;  %v60_v14 = vmul.f32 %v56_v9, %v56_v9 }
  0x13   :  { %v123_v34 = vadd.f32 %v119_v30, %v83_v62  ;;  %v61_v35 = vmul.f32 %v57_v31, %v57_v31  ;;  %v76_v20 = vsub.f32 %v236_v16, %v70_v32  ;;  %v77_v15 = vsub.f32 %v241_v17, %v71_v2 }
  0x14   :  { %v126_v22 = vmul.f32 %v122_v8, %v102_v60  ;;  %v64_v21 = vadd.f32 %v60_v14, %v25_v25  ;;  %v96_v29 = vsub.f32 %v298_v41, %v92_v3  ;;  %v97_v36 = vsub.f32 %v305_v47, %v93_v4 }
  0x15   :  { %v127_v37 = vmul.f32 %v123_v34, %v103_v10  ;;  %v65_v38 = vadd.f32 %v61_v35, %v26_v26  ;;  %v80_v39 = vand.u32 2147483647, %v76_v20  ;;  %v81_v40 = vand.u32 2147483647, %v77_v15 }
  0x16   :  { %v100_v42 = vmul.f32 %v96_v29, %v96_v29  ;;  %v101_v43 = vmul.f32 %v97_v36, %v97_v36  ;;  %v110_v44 = vsel %vm33_vm0, %v106_v55, %v108_v57  ;;  %v111_v16 = vsel %vm33_vm0, %v107_v56, %v109_v61 }
  0x17   :  { %v130_v45 = vadd.f32 %v127_v37, %v126_v22  ;;  %v84_v17 = vadd.f32 %v80_v39, %v44_v12  ;;  %v116_v46 = vsub.f32 %v298_v41, %v110_v44  ;;  %v85_v48 = vadd.f32 %v81_v40, %v45_v33 }
  0x18   :  { %v117_v49 = vsub.f32 %v305_v47, %v111_v16  ;;  %v104_v50 = vadd.f32 %v100_v42, %v64_v21  ;;  %v105_v52 = vadd.f32 %v101_v43, %v65_v38  ;;  %v141_v56 = vand.u32 7, %v221_v13 }
  0x19   :  { %131 = vadd.xlane.f32.xlu0 %v130_v45  ;;  %v120_v51 = vand.u32 2147483647, %v116_v46  ;;  %v136_v61 = vadd.s32 8, %v221_v13 }
  0x1a   :  { %v121_v53 = vand.u32 2147483647, %v117_v49  ;;  %vm161_vm1 = vcmp.eq.s32.totalorder %v141_v56, 0 }
  0x1b   :  { %v124_v54 = vadd.f32 %v120_v51, %v84_v17  ;;  %v148_v62 = vand.u32 7, %v136_v61 }
  0x1c   :  { %v125_v58 = vadd.f32 %v121_v53, %v85_v48 }
  0x1d   :  { %v128_v59 = vmul.f32 %v124_v54, %v104_v50  ;;  %vm162_vm3 = vcmp.eq.s32.totalorder %v148_v62, 0 }
  0x1e   :  { %v129_v60 = vmul.f32 %v125_v58, %v105_v52 }
  0x20   :  { %v133_v55 = vadd.f32 %v129_v60, %v128_v59 }
  0x22   :  { %134 = vadd.xlane.f32.xlu0 %v133_v55 }
  0xa2   :  { %v132_v57 = vpop.xlane.xlu0 %131 }
  0xa3   :  { %v163_v41 = vmul.f32 0.00043402778, %v132_v57 }
  0xa5   :  { %v165_v47 = vsel %vm161_vm1, 0.0, %v163_v41 }
  0xa6   :  { %168 = vst.msk [vmem:[%s382_s2] sm:$0xff] %vm167_vm2, %v165_v47 }
  0xab   :  { %v135_v63 = vpop.xlane.xlu0 %134 }
  0xac   :  { %v164_v0 = vmul.f32 0.00043402778, %v135_v63 }
  0xae   :  { %v166_v5 = vsel %vm162_vm3, 0.0, %v164_v0 }
  0xaf   :  { %169 = vst.msk [vmem:[%s382_s2 + $0x8] sm:$0xff] %vm167_vm2, %v166_v5 }

</bundles_post_ra>
